<compile_context>
chip_gen: v7x
topology: tpu7x:2x2x1
jax: 0.10.0
libtpu: 0.0.40
codegen_flags: <defaults>
</compile_context>

<pallas_src>
import jax
import jax.numpy as jnp
from jax.experimental import pallas as pl
from jax.experimental.pallas import tpu as pltpu


def _attn_kernel(dec_ref, enc_ref, w1e_ref, w2_ref, ctx_ref, attw_ref):
    # dec_ref:  (TB, 1, H)   decoder projection + bias (precomputed, f32)
    # enc_ref:  (TB, S, E)   encoder outputs (f32 or bf16, cast in wrapper)
    # w1e_ref:  (E, H)       attn_combine weight, encoder part (same dtype as enc)
    # w2_ref:   (1, 1, H)    score_layer weight (no bias), f32
    # ctx_ref:  (TB, 1, E)   output context, f32
    # attw_ref: (TB, 1, S)   output attention weights (lane-dense: S on lanes), f32
    TB, S, E = enc_ref.shape
    H = w1e_ref.shape[1]
    f32 = jnp.float32

    enc = enc_ref[...]                       # (TB, S, E), loaded once
    enc2 = enc.reshape(TB * S, E)            # free: S is a multiple of the sublane tile

    # Single big encoder contraction on the MXU: (TB*S, E) @ (E, H) -> f32.
    pre = jnp.dot(enc2, w1e_ref[...], preferred_element_type=f32)   # (TB*S, H)
    pre3 = pre.reshape(TB, S, H)             # free split of the leading dim

    # Decoder projection broadcast over S: sublane-broadcast VPU add, then tanh (EUP).
    energy = jnp.tanh(pre3 + dec_ref[...])   # (TB, S, H), f32

    # Scores, lane-dense: batched (TB,1,H) x (TB,S,H) contracting H -> (TB,1,S).
    # (Tiny FLOP fraction vs the main contraction; kept in f32.)
    w2b = jnp.broadcast_to(w2_ref[...], (TB, 1, H))
    scores = jax.lax.dot_general(
        w2b, energy,
        dimension_numbers=(((2,), (2,)), ((0,), (0,))),
        preferred_element_type=f32)          # (TB, 1, S)

    # Softmax over S (lane axis).  EUP reciprocal + one Newton step -> f32 accuracy.
    m = jnp.max(scores, axis=-1, keepdims=True)
    e = jnp.exp(scores - m)
    denom = jnp.sum(e, axis=-1, keepdims=True)
    inv = pl.reciprocal(denom, approx=True)
    inv = inv * (2.0 - denom * inv)          # Newton refinement
    w = e * inv                              # (TB, 1, S), f32

    attw_ref[...] = w.astype(attw_ref.dtype)

    # Context via batched MXU matmul: (TB,1,S) x (TB,S,E) -> (TB,1,E).
    # Cast only the tiny probability tile to enc's dtype (enc itself is reused,
    # never re-cast in-kernel).
    ctx = jax.lax.dot_general(
        w.astype(enc.dtype), enc,
        dimension_numbers=(((2,), (1,)), ((0,), (0,))),
        preferred_element_type=f32)
    ctx_ref[...] = ctx.astype(ctx_ref.dtype)


def attention_network_bert(decoder_hidden, encoder_outputs, w1, b1, w2,
                           *, block_b=8, matmul_dtype=jnp.float32,
                           vmem_limit_bytes=None):
    """Pallas implementation of AttentionNetworkBERT.forward.

    decoder_hidden:  (1, B, D)  float32
    encoder_outputs: (B, S, E)  float32
    w1: (H, D+E)  attn_combine.weight (PyTorch layout: out_features x in_features)
    b1: (H,)      attn_combine.bias
    w2: (1, H)    score_layer.weight (no bias)
    Returns (context (B, 1, E), attention_weights (B, 1, S)), both float32.
    """
    _, B, D = decoder_hidden.shape
    Be, S, E = encoder_outputs.shape
    assert B == Be
    H = w1.shape[0]
    assert w1.shape[1] == D + E

    # Sublane tiling for the in-kernel (TB,S,E)->(TB*S,E) reshape: 8 for f32,
    # 16 for bf16 (packed sublanes).
    sub = 16 if matmul_dtype == jnp.bfloat16 else 8
    assert S % sub == 0, f"S must be a multiple of {sub} for dtype {matmul_dtype}"
    TB = block_b
    assert TB >= 1

    # --- Wrapper-side glue (plain XLA) -------------------------------------
    dec = decoder_hidden[0]                  # (B, D)
    w1_t = jnp.transpose(w1)                 # (D+E, H), (in, out) layout
    w1d = w1_t[:D, :]                        # (D, H)  decoder part of the concat
    w1e = w1_t[D:, :]                        # (E, H)  encoder part of the concat

    # Hoisted decoder projection + bias: one (B,D)@(D,H) matmul, kept in f32.
    dec_proj = (jnp.dot(dec, w1d, preferred_element_type=jnp.float32)
                + b1.reshape(1, H)).reshape(B, 1, H).astype(jnp.float32)

    # Wrapper-side cast of the big operands (halves DMA/VMEM in the bf16 path).
    enc = encoder_outputs.astype(matmul_dtype)
    w1e_c = w1e.astype(matmul_dtype)
    w2_r = w2.reshape(1, 1, H).astype(jnp.float32)

    # Pad batch up to a multiple of TB (padded rows are zeros -> finite garbage,
    # sliced off below).
    n_blocks = pl.cdiv(B, TB)
    Bp = n_blocks * TB
    if Bp != B:
        dec_proj = jnp.pad(dec_proj, ((0, Bp - B), (0, 0), (0, 0)))
        enc = jnp.pad(enc, ((0, Bp - B), (0, 0), (0, 0)))

    ctx, attw = pl.pallas_call(
        _attn_kernel,
        grid=(n_blocks,),
        in_specs=[
            pl.BlockSpec((TB, 1, H), lambda i: (i, 0, 0)),
            pl.BlockSpec((TB, S, E), lambda i: (i, 0, 0)),
            # Weights: constant index_maps -> VMEM-resident across grid steps.
            pl.BlockSpec((E, H), lambda i: (0, 0)),
            pl.BlockSpec((1, 1, H), lambda i: (0, 0, 0)),
        ],
        out_specs=[
            pl.BlockSpec((TB, 1, E), lambda i: (i, 0, 0)),
            pl.BlockSpec((TB, 1, S), lambda i: (i, 0, 0)),   # lane-dense output
        ],
        out_shape=(
            jax.ShapeDtypeStruct((Bp, 1, E), jnp.float32),
            jax.ShapeDtypeStruct((Bp, 1, S), jnp.float32),
        ),
        compiler_params=pltpu.CompilerParams(
            dimension_semantics=("parallel",),
            vmem_limit_bytes=vmem_limit_bytes),
    )(dec_proj, enc, w1e_c, w2_r)

    return ctx[:B], attw[:B]


def _reference(decoder_hidden, encoder_outputs, w1, b1, w2):
    """Pure-JAX mirror of the PyTorch forward, for correctness checking."""
    B, S, E = encoder_outputs.shape
    dec = jnp.tile(decoder_hidden, (S, 1, 1))            # (S, B, D)
    dec = jnp.transpose(dec, (1, 0, 2))                  # (B, S, D)
    combined = jnp.concatenate([dec, encoder_outputs], axis=2)
    energy = jnp.tanh(combined @ w1.T + b1)              # (B, S, H)
    scores = jnp.squeeze(energy @ w2.T, axis=2)          # (B, S)
    attw = jax.nn.softmax(scores, axis=1)[:, None, :]    # (B, 1, S)
    context = jnp.einsum("bis,bse->bie", attw, encoder_outputs)
    return context, attw


if __name__ == "__main__":
    # Small deterministic shapes: hidden_units H=8, D=E=2H (so concat dim = 4H),
    # S=16 (multiple of 16 so the bf16 path's packed-sublane reshape is free),
    # B=12 (not a multiple of the batch tile -> exercises the pad/slice path;
    # grid has 2 steps -> megacore-shardable on v7x).
    H = 8
    D = 2 * H
    E = 2 * H
    S = 16
    B = 12

    key = jax.random.PRNGKey(0)
    k_dec, k_enc, k_w1, k_b1, k_w2 = jax.random.split(key, 5)

    decoder_hidden = jax.random.normal(k_dec, (1, B, D), dtype=jnp.float32)
    encoder_outputs = jax.random.normal(k_enc, (B, S, E), dtype=jnp.float32)

    # Deterministic "PyTorch-default-like" uniform init for the Linear layers.
    bound1 = 1.0 / jnp.sqrt(jnp.float32(D + E))
    w1 = jax.random.uniform(k_w1, (H, D + E), jnp.float32, -bound1, bound1)
    b1 = jax.random.uniform(k_b1, (H,), jnp.float32, -bound1, bound1)
    bound2 = 1.0 / jnp.sqrt(jnp.float32(H))
    w2 = jax.random.uniform(k_w2, (1, H), jnp.float32, -bound2, bound2)

    ref_ctx, ref_attw = _reference(decoder_hidden, encoder_outputs, w1, b1, w2)

    # f32 path (exact-correctness check; also the v5e-conservative path).
    ctx, attw = attention_network_bert(decoder_hidden, encoder_outputs, w1, b1, w2)
    jax.block_until_ready((ctx, attw))
    assert ctx.shape == (B, 1, E)
    assert attw.shape == (B, 1, S)
    assert jnp.allclose(ctx, ref_ctx, atol=1e-4, rtol=1e-4)
    assert jnp.allclose(attw, ref_attw, atol=1e-4, rtol=1e-4)
    assert jnp.allclose(jnp.sum(attw, axis=-1), 1.0, atol=1e-5)

    # bf16 path (recommended on v5e/v6e/v7x for the MXU-bound contraction):
    # enc/W1e are cast in the wrapper, elementwise math stays f32 -> only matmul
    # rounding differs; loose tolerance.
    ctx_bf, attw_bf = attention_network_bert(
        decoder_hidden, encoder_outputs, w1, b1, w2, matmul_dtype=jnp.bfloat16)
    jax.block_until_ready((ctx_bf, attw_bf))
    assert jnp.allclose(ctx_bf, ref_ctx, atol=5e-2, rtol=5e-2)
    assert jnp.allclose(attw_bf, ref_attw, atol=5e-2, rtol=5e-2)

    print("KERNEL_OK")
</pallas_src>

<mosaic_0001>
module attributes {stable_mosaic.version = 11 : i64} {
  func.func @_attn_kernel(%arg0: i32, %arg1: memref<8x1x8xf32, #tpu.memory_space<vmem>>, %arg2: memref<8x16x16xf32, #tpu.memory_space<vmem>>, %arg3: memref<16x8xf32, #tpu.memory_space<vmem>>, %arg4: memref<1x1x8xf32, #tpu.memory_space<vmem>>, %arg5: memref<8x1x16xf32, #tpu.memory_space<vmem>>, %arg6: memref<8x1x16xf32, #tpu.memory_space<vmem>>) attributes {dimension_semantics = [#tpu.dimension_semantics<parallel>], iteration_bounds = array<i64: 2>, scalar_prefetch = 0 : i64, scratch_operands = 0 : i64, tpu.core_type = #tpu.core_type<tc>, window_params = [{transform_indices = @transform_0, window_bounds = array<i64: 8, 1, 8>}, {transform_indices = @transform_1, window_bounds = array<i64: 8, 16, 16>}, {pipeline_mode = #tpu.pipeline_mode<synchronous>, transform_indices = @transform_2, window_bounds = array<i64: 16, 8>}, {pipeline_mode = #tpu.pipeline_mode<synchronous>, transform_indices = @transform_3, window_bounds = array<i64: 1, 1, 8>}, {transform_indices = @transform_4, window_bounds = array<i64: 8, 1, 16>}, {transform_indices = @transform_5, window_bounds = array<i64: 8, 1, 16>}]} {
    %c0 = arith.constant 0 : index
    %c0_0 = arith.constant 0 : index
    %c0_1 = arith.constant 0 : index
    %0 = vector.load %arg2[%c0, %c0_0, %c0_1] : memref<8x16x16xf32, #tpu.memory_space<vmem>>, vector<8x16x16xf32>
    %1 = vector.shape_cast %0 : vector<8x16x16xf32> to vector<128x16xf32>
    %c0_2 = arith.constant 0 : index
    %c0_3 = arith.constant 0 : index
    %2 = vector.load %arg3[%c0_2, %c0_3] : memref<16x8xf32, #tpu.memory_space<vmem>>, vector<16x8xf32>
    %cst = arith.constant dense<0.000000e+00> : vector<128x8xf32>
    %3 = tpu.matmul %1, %2, %cst {dimension_numbers = #tpu.dot_dimension_numbers<[1], [0], [0], [1], [0, 0, 1, 1], [], []>} : vector<128x16xf32>, vector<16x8xf32>, vector<128x8xf32> -> vector<128x8xf32>
    %4 = vector.shape_cast %3 : vector<128x8xf32> to vector<8x16x8xf32>
    %c0_4 = arith.constant 0 : index
    %c0_5 = arith.constant 0 : index
    %c0_6 = arith.constant 0 : index
    %5 = vector.load %arg1[%c0_4, %c0_5, %c0_6] : memref<8x1x8xf32, #tpu.memory_space<vmem>>, vector<8x1x8xf32>
    %6 = vector.broadcast %5 : vector<8x1x8xf32> to vector<8x16x8xf32>
    %7 = arith.addf %4, %6 : vector<8x16x8xf32>
    %8 = math.tanh %7 : vector<8x16x8xf32>
    %c0_7 = arith.constant 0 : index
    %c0_8 = arith.constant 0 : index
    %c0_9 = arith.constant 0 : index
    %9 = vector.load %arg4[%c0_7, %c0_8, %c0_9] : memref<1x1x8xf32, #tpu.memory_space<vmem>>, vector<1x1x8xf32>
    %10 = vector.shape_cast %9 : vector<1x1x8xf32> to vector<1x1x8xf32>
    %11 = vector.broadcast %10 : vector<1x1x8xf32> to vector<8x1x8xf32>
    %cst_10 = arith.constant dense<0.000000e+00> : vector<8x1x16xf32>
    %12 = tpu.matmul %11, %8, %cst_10 {dimension_numbers = #tpu.dot_dimension_numbers<[2], [2], [1], [1], [0, 0, 0, 1, 1, 1], [0], [0]>} : vector<8x1x8xf32>, vector<8x16x8xf32>, vector<8x1x16xf32> -> vector<8x1x16xf32>
    %cst_11 = arith.constant dense<0xFF800000> : vector<8x1xf32>
    %13 = vector.multi_reduction <maximumf>, %12, %cst_11 [2] : vector<8x1x16xf32> to vector<8x1xf32>
    %14 = vector.shape_cast %13 : vector<8x1xf32> to vector<8x1x1xf32>
    %15 = vector.broadcast %14 : vector<8x1x1xf32> to vector<8x1x16xf32>
    %16 = arith.subf %12, %15 : vector<8x1x16xf32>
    %17 = math.exp %16 : vector<8x1x16xf32>
    %cst_12 = arith.constant dense<0.000000e+00> : vector<8x1xf32>
    %18 = vector.multi_reduction <add>, %17, %cst_12 [2] : vector<8x1x16xf32> to vector<8x1xf32>
    %19 = vector.shape_cast %18 : vector<8x1xf32> to vector<8x1x1xf32>
    %20 = tpu.reciprocal %19 {approx = true} : vector<8x1x1xf32> -> vector<8x1x1xf32>
    %21 = arith.mulf %19, %20 : vector<8x1x1xf32>
    %cst_13 = arith.constant 2.000000e+00 : f32
    %22 = vector.broadcast %cst_13 : f32 to vector<8x1x1xf32>
    %23 = arith.subf %22, %21 : vector<8x1x1xf32>
    %24 = arith.mulf %20, %23 : vector<8x1x1xf32>
    %25 = vector.broadcast %24 : vector<8x1x1xf32> to vector<8x1x16xf32>
    %26 = arith.mulf %17, %25 : vector<8x1x16xf32>
    %c0_14 = arith.constant 0 : index
    %c0_15 = arith.constant 0 : index
    %c0_16 = arith.constant 0 : index
    %27 = vector.load %arg6[%c0_14, %c0_15, %c0_16] : memref<8x1x16xf32, #tpu.memory_space<vmem>>, vector<8x1x16xf32>
    tpu.vector_store %arg6[%c0_14, %c0_15, %c0_16], %26 {strides = array<i32>} : memref<8x1x16xf32, #tpu.memory_space<vmem>>, vector<8x1x16xf32>,
    %cst_17 = arith.constant dense<0.000000e+00> : vector<8x1x16xf32>
    %28 = tpu.matmul %26, %0, %cst_17 {dimension_numbers = #tpu.dot_dimension_numbers<[2], [1], [1], [2], [0, 0, 0, 1, 1, 2], [0], [0]>} : vector<8x1x16xf32>, vector<8x16x16xf32>, vector<8x1x16xf32> -> vector<8x1x16xf32>
    %c0_18 = arith.constant 0 : index
    %c0_19 = arith.constant 0 : index
    %c0_20 = arith.constant 0 : index
    %29 = vector.load %arg5[%c0_18, %c0_19, %c0_20] : memref<8x1x16xf32, #tpu.memory_space<vmem>>, vector<8x1x16xf32>
    tpu.vector_store %arg5[%c0_18, %c0_19, %c0_20], %28 {strides = array<i32>} : memref<8x1x16xf32, #tpu.memory_space<vmem>>, vector<8x1x16xf32>,
    return
  }
  func.func @transform_0(%arg0: i32) -> (i32, i32, i32) {
    %c0_i32 = arith.constant 0 : i32
    %c0_i32_0 = arith.constant 0 : i32
    %c0_i32_1 = arith.constant 0 : i32
    return %arg0, %c0_i32, %c0_i32_0 : i32, i32, i32
  }
  func.func @transform_1(%arg0: i32) -> (i32, i32, i32) {
    %c0_i32 = arith.constant 0 : i32
    %c0_i32_0 = arith.constant 0 : i32
    %c0_i32_1 = arith.constant 0 : i32
    return %arg0, %c0_i32, %c0_i32_0 : i32, i32, i32
  }
  func.func @transform_2(%arg0: i32) -> (i32, i32) {
    %c0_i32 = arith.constant 0 : i32
    %c0_i32_0 = arith.constant 0 : i32
    %c0_i32_1 = arith.constant 0 : i32
    return %c0_i32, %c0_i32_0 : i32, i32
  }
  func.func @transform_3(%arg0: i32) -> (i32, i32, i32) {
    %c0_i32 = arith.constant 0 : i32
    %c0_i32_0 = arith.constant 0 : i32
    %c0_i32_1 = arith.constant 0 : i32
    %c0_i32_2 = arith.constant 0 : i32
    return %c0_i32, %c0_i32_0, %c0_i32_1 : i32, i32, i32
  }
  func.func @transform_4(%arg0: i32) -> (i32, i32, i32) {
    %c0_i32 = arith.constant 0 : i32
    %c0_i32_0 = arith.constant 0 : i32
    %c0_i32_1 = arith.constant 0 : i32
    return %arg0, %c0_i32, %c0_i32_0 : i32, i32, i32
  }
  func.func @transform_5(%arg0: i32) -> (i32, i32, i32) {
    %c0_i32 = arith.constant 0 : i32
    %c0_i32_0 = arith.constant 0 : i32
    %c0_i32_1 = arith.constant 0 : i32
    return %arg0, %c0_i32, %c0_i32_0 : i32, i32, i32
  }
}

</mosaic_0001>

<bundles_post_ra>
// kernel: tpu_custom_call.1
= control target key start
LH: loop header
LB: loop body
LE: loop exit
PB: predicated region body
PF: predicated region fallthrough
CT: control target
= control target key end

     0   :  { %11 = vsyncpa [#allocation3], 0  ;;  %s3210_s0 = inlined_call_operand.vmem [shape: f32[16,1,8], index: 0, kind: input, shape index: {}]   ;;  %s3211_s1 = inlined_call_operand.hbm [shape: f32[16,16,16], index: 1, kind: input, shape index: {}]   ;;  %s3212_s2 = inlined_call_operand.vmem [shape: f32[16,8], index: 2, kind: input, shape index: {}]   ;;  %s3213_s3 = inlined_call_operand.vmem [shape: f32[1,1,8], index: 3, kind: input, shape index: {}]   ;;  %s3214_s4 = inlined_call_operand.hbm [shape: f32[16,1,16], index: 4, kind: output, shape index: {0}]   ;;  %s3215_s5 = inlined_call_operand.hbm [shape: f32[16,1,16], index: 5, kind: output, shape index: {1}]  }
   0x1   :  { %13 = vsyncpa [#allocation3 + $0x1], 0 }
   0x2   :  { %14 = vsyncpa [#allocation4], 0 }
   0x3   :  { %16 = vsyncpa [#allocation4 + $0x1], 0 }
   0x4   :  { %17 = vsyncpa [#allocation7], 0 }
   0x5   :  { %19 = vsyncpa [#allocation7 + $0x1], 0  ;;  %s2690_s18 = smov 0   ;;  %s2692_s19 = smov 0  }
   0x6   :  { %s2694_s20 = smov 0   ;;  %s2696_s21 = smov 0  }
   0x7 LB: > { %s2711_s22 = sadd.s32 4294967295, %s2648_s21   ;;  %s2052_s23 = sadd.s32 4294967294, %s2648_s21   ;;  %s2648_s21 = sphi %s2696_s21, %s3230_s21   ;;  %s2644_s20 = sphi %s2694_s20, %s3229_s20   ;;  %s2640_s19 = sphi %s2692_s19, %s3228_s19   ;;  %s2636_s18 = sphi %s2690_s18, %s3227_s18  }
   0x8   : > { %s2715_s24 = sadd.s32 1, %s2648_s21   ;;  %s58_s25 = sadd.s32 1, %s2644_s20 }
   0x9   : > { %s55_s26 = ssub.s32 %s2648_s21, %s2715_s24  ;;  %p65_p0 = scmp.ne.s32.totalorder %s2644_s20, %s2640_s19 }
   0xa   : > { %p56_p1 = scmp.eq.s32.totalorder %s55_s26, 0  ;;  %p66_p2 = scmp.eq.s32.totalorder %s2648_s21, 0 }
   0xb   : > { %p71_p3 = scmp.ne.s32.totalorder %s2640_s19, %s2636_s18  ;;  %p72_p4 = scmp.eq.s32.totalorder %s2711_s22, 0 }
   0xc   : > { %s2727_s27 = scalar_select %p56_p1, %s2644_s20, %s58_s25  }
   0xd   : > { %p2729_p5 = por %p66_p2, %p65_p0  ;;  %p2733_p6 = por %p72_p4, %p71_p3 }
   0xe   : > { %p137_p7 = scmp.eq.s32.totalorder %s2711_s22, 1  ;;  %p143_p8 = scmp.eq.s32.totalorder %s2052_s23, 1 }
   0xf   : > { %p2415_p10 = scmp.lt.s32.totalorder %s2648_s21, 2  ;;  %s203_s7 = sand.u32 1, %s2644_s20  }
  0x10   : > { %p2740_p11 = por %p137_p7, %p65_p0  ;;  %p2744_p12 = por %p143_p8, %p71_p3 }
  0x11   : > { %s2129_s8 = sshll.u32 %s2648_s21, 11  ;;  %s2055_s9 = sshll.u32 %s203_s7, 7 }
  0x12   : > { %s3219_s30 = scalar_select %p2740_p11, 1, 0 }
  0x13   : > { %s3220_s6 = scalar_select %p2744_p12, 1, 0 }
  0x14   : > { %s2753_s12 = scalar_lea.hbm %s3211_s1, %s2129_s8  ;;  %s207_s13 = scalar_lea.vmem [#allocation2], %s2055_s9 }
  0x15   : > { %s215_s14 = sshll.u32 %s207_s13, 4  ;;  %p2757_p13 = pnand %p2415_p10, %p2729_p5  ;;  %s2761_s14 = int_to_ptr.vmem [resolvable:$true] %s215_s14 }
  0x16   : > { %s2763_s16 = scalar_lea.sflag [#allocation3], %s203_s7  ;;  %s2520_s17 = scalar_lea.hbm %s2753_s12, 2048 }
  0x17   : > { %p2521_p0 = scmp.ne.s32.totalorder %s2753_s12, %s2520_s17  ;;  %p2522_p1 = pneg %p2757_p13 }
  0x18   : > { %s2525_s26 = scalar_lea.hbm %s3211_s1, 4096  ;;  %p2526_p4 = scmp.lt.u32.totalorder %s2753_s12, %s3211_s1 }
  0x19   : > { %p2523_p2 = pnand %p2522_p1, %p2521_p0  ;;  %p2527_p5 = scmp.lt.u32.totalorder %s2525_s26, %s2520_s17 }
  0x1a   : > { %p2529_p8 = scmp.lt.u32.totalorder %s2520_s17, %s2753_s12 }
  0x1b   : > { %p2524_p3 = pneg %p2523_p2  ;;  %p2528_p7 = por %p2527_p5, %p2526_p4 }
  0x1d   : > { %p2530_p10 = por %p2529_p8, %p2528_p7 }
  0x1f   : > { %p2531_p9 = pnand %p2530_p10, %p2524_p3 }
  0x21   : > { %2534 = shalt.err (!%p2531_p9)
}
  0x22   : > { %s2535_s7 = scalar_lea.vmem %s2761_s14, 2048  ;;  %s2650_s9 = smov [#allocation2]  }
  0x23   : > { %p2536_p0 = scmp.ne.s32.totalorder %s2761_s14, %s2535_s7  ;;  %s2540_s10 = sshll.u32 %s2650_s9, 4  ;;  %s2541_s10 = int_to_ptr.vmem [resolvable:$false] %s2540_s10 }
  0x24   : > { %s2542_s11 = scalar_lea.vmem %s2541_s10, 4096  ;;  %p2543_p11 = scmp.lt.s32.totalorder %s2761_s14, %s2541_s10 }
  0x25   : > { %p2538_p2 = pnand %p2536_p0, %p2522_p1  ;;  %p2544_p4 = scmp.lt.s32.totalorder %s2542_s11, %s2535_s7 }
  0x27   : > { %p2539_p12 = pneg %p2538_p2  ;;  %p2545_p5 = por %p2544_p4, %p2543_p11 }
  0x29   : > { %p2546_p7 = pnand %p2545_p5, %p2539_p12 }
  0x2b   : > { %2549 = shalt.err (!%p2546_p7)
}
  0x2c   : > { %s2651_s13 = smov 128   ;;  %s2652_s17 = smov 8  }
  0x2d   : > { %2407 = dma.hbm_to_vmem [thread:$0]  (!%p2757_p13), %s2753_s12, 2048, %s2761_s14, %s2763_s16, %s2651_s13, %s2651_s13, %s2652_s17  }
  0x2e   : > { %p2059_p9 = scmp.ge.s32.totalorder %s2648_s21, 1  ;;  %p223_p1 = scmp.lt.s32.totalorder %s2648_s21, 3 }
  0x30   : > { %p224_p3 = pnand %p2059_p9, %p223_p1 }
  0x31   : > { %s2794_s23 = sand.u32 (!%p224_p3), 1, %s2640_s19  }
  0x32   : > { %227 = sbr.rel (%p224_p3) target bundleno = 1098 (0x44a), region = 36  ;;  %s2060_s25 = sshll.u32 (!%p224_p3), %s2794_s23, 7 }
  0x33   : > { %s230_s26 = scalar_lea.sflag (!%p224_p3), [#allocation3], %s2794_s23  ;;  %s2798_s28 = scalar_lea.vmem (!%p224_p3), [#allocation2], %s2060_s25 }
  0x39   : > { %2623 = dma.done.wait (%p2733_p6), %s230_s26, 2048  }
  0x3a   : > { %2625 = vsyncadd (%p2733_p6), %s230_s26, 4294965248  ;;  %vm295_vm0 = vcmask 130048   ;;  %v293_v0 = vld [vmem:[%s3212_s2] sm:$0xff]  ;;  %v294_v1 = vld [vmem:[%s3212_s2 + $0x8] sm:$0xff]  ;;  %v2653_v27 = vmov 0.0|0.0   ;;  %vm2654_vm1 = vmmov 0  }
  0x3b   : > { %v2811_v2 = vld [vmem:[%s2798_s28] sm:$0xff]  ;;  %v2338_v3 = vpack.c.bf16 %v294_v1, %v293_v0  ;;  %v2814_v4 = vld [vmem:[%s2798_s28 + $0x8] sm:$0xff]  ;;  %v2819_v5 = vld [vmem:[%s2798_s28 + $0x10] sm:$0xff]  ;;  %2342 = vmatprep.subr.bf16.mxu1 %v2653_v27  ;;  %v2655_v28 = vmov 0.0   ;;  %s2063_s29 = sshll.u32 %s2711_s22, 3  ;;  %vm578_vm2 = vcmask 64512  }
  0x3c   : > { %2202 = vmatprep.mubr.msk.f32.mxu0 %vm295_vm0, %v2811_v2  ;;  %v2822_v6 = vld [vmem:[%s2798_s28 + $0x18] sm:$0xff]  ;;  %v2375_v7 = vpack.c.bf16 %v2814_v4, %v2811_v2  ;;  %v2829_v9 = vld [vmem:[%s2798_s28 + $0x20] sm:$0xff]  ;;  %v2832_v10 = vld [vmem:[%s2798_s28 + $0x28] sm:$0xff]  ;;  %2230 = vmatprep.mubr.msk.f32.mxu1 %vm2654_vm1, %v2655_v28  ;;  %p270_p6 = scmp.lt.s32.totalorder %s2063_s29, 15  ;;  %vm1190_vm4 = vcmask 122880   ;;  %s2061_s13 = sshll.u32 %s2794_s23, 3 }
  0x3d   : > { %v2378_v8 = vpack.c.bf16 %v2822_v6, %v2819_v5  ;;  %v2835_v11 = vld [vmem:[%s2798_s28 + $0x30] sm:$0xff]  ;;  %2339 = vmatprep.subr.bf16.mxu0 %v2338_v3  ;;  %v2381_v12 = vpack.c.bf16 %v2832_v10, %v2829_v9  ;;  %v2840_v13 = vld [vmem:[%s2798_s28 + $0x38] sm:$0xff]  ;;  %v2843_v14 = vld [vmem:[%s2798_s28 + $0x40] sm:$0xff]  ;;  %s3041_s17 = scalar_lea.vmem [#allocation6], %s2061_s13  ;;  %s2130_s25 = sshll.u32 %s2711_s22, 7 }
  0x3e   : > { %v2846_v15 = vld [vmem:[%s2798_s28 + $0x48] sm:$0xff]  ;;  %2341 = vmatpush3.bf16.msra.mxu0 %v2338_v3  ;;  %v2384_v16 = vpack.c.bf16 %v2840_v13, %v2835_v11  ;;  %v2853_v18 = vld [vmem:[%s2798_s28 + $0x50] sm:$0xff]  ;;  %v2856_v19 = vld [vmem:[%s2798_s28 + $0x58] sm:$0xff]  ;;  %s3232_s29 = smov (!%p270_p6, %s2063_s29), 15  ;;  %s3114_s12 = scalar_lea.hbm %s3215_s5, %s2130_s25 }
  0x3f   : > { %v2387_v17 = vpack.c.bf16 %v2846_v15, %v2843_v14  ;;  %v2859_v20 = vld [vmem:[%s2798_s28 + $0x60] sm:$0xff]  ;;  %v2390_v21 = vpack.c.bf16 %v2856_v19, %v2853_v18  ;;  %v2864_v22 = vld [vmem:[%s2798_s28 + $0x68] sm:$0xff]  ;;  %v2867_v23 = vld [vmem:[%s2798_s28 + $0x70] sm:$0xff]  ;;  %2358 = vmatprep.subr.bf16.mxu0 %v2653_v27  ;;  %s2916_s9 = scalar_lea.vmem %s3210_s0, %s3232_s29  ;;  %s1938_s14 = sshll.u32 %s3041_s17, 4  ;;  %s3117_s14 = int_to_ptr.vmem [resolvable:$true] %s1938_s14 }
  0x40   : > { %v2870_v24 = vld [vmem:[%s2798_s28 + $0x78] sm:$0xff]  ;;  %v2393_v25 = vpack.c.bf16 %v2864_v22, %v2859_v20  ;;  %v2080_v29 = vld [vmem:[%s2916_s9] ss:$0 sm:$0xff]  ;;  %v2081_v34 = vld [vmem:[%s2916_s9 + $0x1] ss:$0 sm:$0xff]  ;;  %s1909_s15 = scalar_lea.sflag [#allocation7], %s2794_s23 }
  0x41   : > { %v2396_v26 = vpack.c.bf16 %v2870_v24, %v2867_v23  ;;  %2203 = vmatmul.mubr.msk.f32.vlgmr.msra.gmra.mrb[0].mxu0 %vm295_vm0, %v2814_v4  ;;  %v2082_v39 = vld [vmem:[%s2916_s9 + $0x2] ss:$0 sm:$0xff]  ;;  %v2083_v44 = vld [vmem:[%s2916_s9 + $0x3] ss:$0 sm:$0xff]  ;;  %v2084_v51 = vld [vmem:[%s2916_s9 + $0x4] ss:$0 sm:$0xff] }
  0x42   : > { %2205 = vmatprep.mubr.msk.f32.mxu0 %vm295_vm0, %v2819_v5  ;;  %vm2925_vm3 = vmpackc.low %vm578_vm2, %vm578_vm2  ;;  %v2085_v60 = vld [vmem:[%s2916_s9 + $0x5] ss:$0 sm:$0xff]  ;;  %v2936_v3 = vld [vmem:[%s3213_s3] sm:$0x1]  ;;  %s2550_s16 = scalar_lea.vmem %s3117_s14, 128  ;;  %p3224_p12 = scmp.ne.s32.totalorder %s3219_s30, 0 }
  0x43   : > { %p2551_p11 = scmp.ne.s32.totalorder %s3117_s14, %s2550_s16  ;;  %s2656_s29 = smov [#allocation6]  }
  0x44   : > { %s2554_s8 = sshll.u32 %s2656_s29, 4  ;;  %s2555_s8 = int_to_ptr.vmem [resolvable:$false] %s2554_s8 }
  0x45   : > { %2206 = vmatmul.mubr.msk.f32.gmra.mrb[2].mxu0 %vm295_vm0, %v2822_v6  ;;  %p2552_p13 = pnand %p2551_p11, %p3224_p12  ;;  %s2556_s7 = scalar_lea.vmem %s2555_s8, 256 }
  0x46   : > { %2208 = vmatprep.mubr.msk.f32.mxu0 %vm295_vm0, %v2829_v9  ;;  %p2557_p10 = scmp.lt.s32.totalorder %s3117_s14, %s2555_s8  ;;  %p2558_p0 = scmp.lt.s32.totalorder %s2556_s7, %s2550_s16 }
  0x47   : > { %p2553_p8 = pneg %p2552_p13 }
  0x48   : > { %p2559_p2 = por %p2558_p0, %p2557_p10 }
  0x49   : > { %2209 = vmatmul.mubr.msk.f32.gmra.mrb[4].mxu0 %vm295_vm0, %v2832_v10 }
  0x4a   : > { %2211 = vmatprep.mubr.msk.f32.mxu0 %vm295_vm0, %v2835_v11  ;;  %p2560_p4 = pnand %p2559_p2, %p2553_p8 }
  0x4d   : > { %2212 = vmatmul.mubr.msk.f32.gmra.mrb[6].mxu0 %vm295_vm0, %v2840_v13 }
  0x4e   : > { %2214 = vmatprep.mubr.msk.f32.mxu0 %vm295_vm0, %v2843_v14 }
  0x51   : > { %2215 = vmatmul.mubr.msk.f32.gmra.mrb[8].mxu0 %vm295_vm0, %v2846_v15 }
  0x52   : > { %2217 = vmatprep.mubr.msk.f32.mxu0 %vm295_vm0, %v2853_v18 }
  0x55   : > { %2218 = vmatmul.mubr.msk.f32.gmra.mrb[10].mxu0 %vm295_vm0, %v2856_v19 }
  0x56   : > { %2220 = vmatprep.mubr.msk.f32.mxu0 %vm295_vm0, %v2859_v20 }
  0x59   : > { %2221 = vmatmul.mubr.msk.f32.gmra.mrb[12].mxu0 %vm295_vm0, %v2864_v22 }
  0x5a   : > { %2223 = vmatprep.mubr.msk.f32.mxu0 %vm295_vm0, %v2867_v23 }
  0x5d   : > { %2224 = vmatmul.mubr.msk.f32.gmra.mrb[14].mxu0 %vm295_vm0, %v2870_v24 }
  0x5e   : > { %2258 = vmatprep.mubr.msk.f32.mxu0 %vm2654_vm1, %v2655_v28 }
 0x114   : > { %v2204_v30 = vpop.f32.mrb[0].mxu0 }
 0x115   : > { %v546_v31 = vadd.f32 %v2204_v30, %v2080_v29  ;;  %v410_v32 = vpop.f32.mrb[1].mxu0 }
 0x116   : > { %v545_v33 = vadd.f32 %v2080_v29, %v410_v32 }
 0x117   : > { %2456 = vtanh.f32 %v546_v31  ;;  %v2086_v31 = vld [vmem:[%s2916_s9 + $0x6] ss:$0 sm:$0xff] }
 0x118   : > { %2458 = vtanh.f32 %v545_v33  ;;  %v2207_v35 = vpop.f32.mrb[2].mxu0 }
 0x119   : > { %v548_v36 = vadd.f32 %v2207_v35, %v2081_v34  ;;  %v420_v37 = vpop.f32.mrb[3].mxu0 }
 0x11a   : > { %v547_v38 = vadd.f32 %v2081_v34, %v420_v37 }
 0x11b   : > { %2460 = vtanh.f32 %v548_v36 }
 0x11c   : > { %2462 = vtanh.f32 %v547_v38  ;;  %v2210_v40 = vpop.f32.mrb[4].mxu0 }
 0x11d   : > { %v550_v41 = vadd.f32 %v2210_v40, %v2082_v39  ;;  %v430_v42 = vpop.f32.mrb[5].mxu0 }
 0x11e   : > { %v549_v43 = vadd.f32 %v2082_v39, %v430_v42  ;;  %v2087_v39 = vld [vmem:[%s2916_s9 + $0x7] ss:$0 sm:$0xff] }
 0x11f   : > { %2464 = vtanh.f32 %v550_v41 }
 0x120   : > { %2466 = vtanh.f32 %v549_v43  ;;  %v2213_v45 = vpop.f32.mrb[6].mxu0 }
 0x121   : > { %v2457_v46 = vpop.eup %2456  ;;  %v552_v47 = vadd.f32 %v2213_v45, %v2083_v44  ;;  %v440_v48 = vpop.f32.mrb[7].mxu0 }
 0x122   : > { %v2459_v49 = vpop.eup %2458  ;;  %v551_v50 = vadd.f32 %v2083_v44, %v440_v48 }
 0x123   : > { %2468 = vtanh.f32 %v552_v47  ;;  %v2343_v53 = vpack.c.bf16 %v2457_v46, %v2459_v49 }
 0x124   : > { %2470 = vtanh.f32 %v551_v50  ;;  %v2216_v54 = vpop.f32.mrb[8].mxu0 }
 0x125   : > { %v2461_v55 = vpop.eup %2460  ;;  %v554_v56 = vadd.f32 %v2216_v54, %v2084_v51  ;;  %v450_v57 = vpop.f32.mrb[9].mxu0  ;;  %2345 = vmatpush3.bf16.xpose.msk.msra.mxu1 %vm2925_vm3, %v2343_v53 }
 0x126   : > { %v2463_v58 = vpop.eup %2462  ;;  %v553_v59 = vadd.f32 %v2084_v51, %v450_v57  ;;  %2346 = vmatprep.subr.bf16.mxu1 %v2653_v27 }
 0x127   : > { %2472 = vtanh.f32 %v554_v56  ;;  %v2347_v61 = vpack.c.bf16 %v2461_v55, %v2463_v58 }
 0x128   : > { %2474 = vtanh.f32 %v553_v59  ;;  %v2219_v62 = vpop.f32.mrb[10].mxu0 }
 0x129   : > { %v2465_v63 = vpop.eup %2464  ;;  %v556_v0 = vadd.f32 %v2219_v62, %v2085_v60  ;;  %v460_v1 = vpop.f32.mrb[11].mxu0 }
 0x12a   : > { %v2467_v29 = vpop.eup %2466  ;;  %v555_v30 = vadd.f32 %v2085_v60, %v460_v1 }
 0x12b   : > { %2476 = vtanh.f32 %v556_v0  ;;  %v2351_v32 = vpack.c.bf16 %v2465_v63, %v2467_v29 }
 0x12c   : > { %2478 = vtanh.f32 %v555_v30  ;;  %v2222_v33 = vpop.f32.mrb[12].mxu0  ;;  %2231 = vmatmul.mubr.msk.f32.vlgmr.msra.gmra.mrb[0].mxu1 %vm578_vm2, %v2936_v3 }
 0x12d   : > { %v2469_v34 = vpop.eup %2468  ;;  %v558_v35 = vadd.f32 %v2222_v33, %v2086_v31  ;;  %v470_v36 = vpop.f32.mrb[13].mxu0  ;;  %2349 = vmatpush3.bf16.xpose.msk.msra.mxu1 %vm2925_vm3, %v2347_v61  ;;  %2237 = vmatprep.mubr.msk.f32.mxu1 %vm2654_vm1, %v2655_v28 }
 0x12e   : > { %v2471_v37 = vpop.eup %2470  ;;  %v557_v38 = vadd.f32 %v2086_v31, %v470_v36  ;;  %2350 = vmatprep.subr.bf16.mxu1 %v2653_v27 }
 0x12f   : > { %2480 = vtanh.f32 %v558_v35  ;;  %v2355_v40 = vpack.c.bf16 %v2469_v34, %v2471_v37 }
 0x130   : > { %2482 = vtanh.f32 %v557_v38  ;;  %v2225_v41 = vpop.f32.mrb[14].mxu0 }
 0x131   : > { %v2473_v42 = vpop.eup %2472  ;;  %v560_v43 = vadd.f32 %v2225_v41, %v2087_v39  ;;  %v480_v44 = vpop.f32.mrb[15].mxu0 }
 0x132   : > { %v2475_v45 = vpop.eup %2474  ;;  %v559_v46 = vadd.f32 %v2087_v39, %v480_v44 }
 0x133   : > { %v2359_v47 = vpack.c.bf16 %v2473_v42, %v2475_v45  ;;  %2484 = vtanh.f32 %v560_v43 }
 0x134   : > { %2238 = vmatmul.mubr.msk.f32.vlgmr.msra.gmra.mrb[2].mxu1 %vm578_vm2, %v2936_v3  ;;  %2486 = vtanh.f32 %v559_v46 }
 0x135   : > { %v2477_v48 = vpop.eup %2476  ;;  %2353 = vmatpush3.bf16.xpose.msk.msra.mxu1 %vm2925_vm3, %v2351_v32  ;;  %2361 = vmatpush3.bf16.xpose.msk.msra.mxu0 %vm2925_vm3, %v2359_v47 }
 0x136   : > { %v2479_v49 = vpop.eup %2478  ;;  %2244 = vmatprep.mubr.msk.f32.mxu1 %vm2654_vm1, %v2655_v28  ;;  %2354 = vmatprep.subr.bf16.mxu1 %v2653_v27 }
 0x137   : > { %2366 = vmatprep.subr.bf16.mxu0 %v2653_v27  ;;  %v2363_v50 = vpack.c.bf16 %v2477_v48, %v2479_v49 }
 0x139   : > { %v2481_v51 = vpop.eup %2480 }
 0x13a   : > { %v2483_v53 = vpop.eup %2482 }
 0x13b   : > { %v2367_v54 = vpack.c.bf16 %v2481_v51, %v2483_v53 }
 0x13c   : > { %2245 = vmatmul.mubr.msk.f32.vlgmr.msra.gmra.mrb[4].mxu1 %vm578_vm2, %v2936_v3  ;;  %2259 = vmatmul.mubr.msk.f32.vlgmr.msra.gmra.mrb[16].mxu0 %vm578_vm2, %v2936_v3 }
 0x13d   : > { %v2485_v55 = vpop.eup %2484  ;;  %2357 = vmatpush3.bf16.xpose.msk.msra.mxu1 %vm2925_vm3, %v2355_v40  ;;  %2369 = vmatpush3.bf16.xpose.msk.msra.mxu0 %vm2925_vm3, %v2367_v54 }
 0x13e   : > { %v2487_v56 = vpop.eup %2486  ;;  %2251 = vmatprep.mubr.msk.f32.mxu1 %vm2654_vm1, %v2655_v28  ;;  %2272 = vmatprep.mubr.msk.f32.mxu0 %vm2654_vm1, %v2655_v28 }
 0x13f   : > { %2362 = vmatprep.subr.bf16.mxu1 %v2653_v27  ;;  %v2371_v57 = vpack.c.bf16 %v2485_v55, %v2487_v56  ;;  %2374 = vmatprep.subr.bf16.mxu0 %v2653_v27 }
 0x144   : > { %2252 = vmatmul.mubr.msk.f32.vlgmr.msra.gmra.mrb[6].mxu1 %vm578_vm2, %v2936_v3  ;;  %2273 = vmatmul.mubr.msk.f32.vlgmr.msra.gmra.mrb[18].mxu0 %vm578_vm2, %v2936_v3 }
 0x145   : > { %2365 = vmatpush3.bf16.xpose.msk.msra.mxu1 %vm2925_vm3, %v2363_v50  ;;  %2265 = vmatprep.mubr.msk.f32.mxu1 %vm2654_vm1, %v2655_v28 }
 0x146   : > { %2370 = vmatprep.subr.bf16.mxu1 %v2653_v27  ;;  %2376 = vmatpush3.bf16.msra.mxu0 %v2375_v7 }
 0x147   : > { %2286 = vmatprep.mubr.msk.f32.mxu0 %vm2654_vm1, %v2655_v28  ;;  %2377 = vmatprep.subr.bf16.mxu0 %v2653_v27 }
 0x14c   : > { %2266 = vmatmul.mubr.msk.f32.vlgmr.msra.gmra.mrb[8].mxu1 %vm578_vm2, %v2936_v3 }
 0x14d   : > { %2373 = vmatpush3.bf16.xpose.msk.msra.mxu1 %vm2925_vm3, %v2371_v57  ;;  %2279 = vmatprep.mubr.msk.f32.mxu1 %vm2654_vm1, %v2655_v28 }
 0x14e   : > { %2380 = vmatprep.subr.bf16.mxu1 %v2653_v27 }
 0x154   : > { %2280 = vmatmul.mubr.msk.f32.vlgmr.msra.gmra.mrb[10].mxu1 %vm578_vm2, %v2936_v3 }
 0x155   : > { %2382 = vmatpush3.bf16.msra.mxu1 %v2381_v12  ;;  %2300 = vmatprep.mubr.msk.f32.mxu1 %vm2654_vm1, %v2655_v28 }
 0x156   : > { %2386 = vmatprep.subr.bf16.mxu1 %v2653_v27 }
 0x1ff   : > { %v654_v2 = vpop.f32.mrb[0].mxu1 }
 0x200   : > { %v1191_v4 = vsel %vm1190_vm4, %v654_v2, -inf  ;;  %v2232_v7 = vpop.f32.mrb[1].mxu1 }
 0x201   : > { %1192 = vmax.xlane.f32.xlu0 %v1191_v4 }
 0x207   : > { %v730_v52 = vpop.f32.mrb[2].mxu1 }
 0x208   : > { %v1194_v58 = vsel %vm1190_vm4, %v730_v52, -inf  ;;  %v2239_v59 = vpop.f32.mrb[3].mxu1 }
 0x209   : > { %1195 = vmax.xlane.f32.xlu0 %v1194_v58 }
 0x20f   : > { %v806_v60 = vpop.f32.mrb[4].mxu1  ;;  %v958_v61 = vpop.f32.mrb[16].mxu0 }
 0x210   : > { %v1197_v9 = vsel %vm1190_vm4, %v806_v60, -inf  ;;  %v1203_v10 = vsel %vm1190_vm4, %v958_v61, -inf  ;;  %v2246_v12 = vpop.f32.mrb[5].mxu1  ;;  %v2260_v62 = vpop.f32.mrb[17].mxu0 }
 0x211   : > { %1198 = vmax.xlane.f32.xlu1 %v1197_v9  ;;  %1204 = vmax.xlane.f32.xlu0 %v1203_v10 }
 0x217   : > { %v882_v63 = vpop.f32.mrb[6].mxu1  ;;  %v1110_v0 = vpop.f32.mrb[18].mxu0 }
 0x218   : > { %v1200_v1 = vsel %vm1190_vm4, %v882_v63, -inf  ;;  %v1209_v3 = vsel %vm1190_vm4, %v1110_v0, -inf  ;;  %v2253_v29 = vpop.f32.mrb[7].mxu1  ;;  %v2274_v30 = vpop.f32.mrb[19].mxu0 }
 0x219   : > { %1201 = vmax.xlane.f32.xlu1 %v1200_v1  ;;  %1210 = vmax.xlane.f32.xlu0 %v1209_v3 }
 0x21f   : > { %v1034_v31 = vpop.f32.mrb[8].mxu1 }
 0x220   : > { %v1206_v32 = vsel %vm1190_vm4, %v1034_v31, -inf  ;;  %v2267_v33 = vpop.f32.mrb[9].mxu1 }
 0x221   : > { %1207 = vmax.xlane.f32.xlu1 %v1206_v32 }
 0x227   : > { %v1186_v34 = vpop.f32.mrb[10].mxu1 }
 0x228   : > { %v1212_v35 = vsel %vm1190_vm4, %v1186_v34, -inf  ;;  %v2281_v36 = vpop.f32.mrb[11].mxu1 }
 0x229   : > { %1213 = vmax.xlane.f32.xlu1 %v1212_v35 }
 0x28e   : > { %v1193_v37 = vpop.xlane.xlu0 %1192 }
 0x28f   : > { %v1215_v38 = vsub.f32 %v654_v2, %v1193_v37 }
 0x291   : > { %v1223_v39 = vmul.f32 1.442695, %v1215_v38 }
 0x293   : > { %2488 = vpow2.f32 %v1223_v39 }
 0x296   : > { %v1196_v40 = vpop.xlane.xlu0 %1195 }
 0x297   : > { %v1216_v41 = vsub.f32 %v730_v52, %v1196_v40 }
 0x299   : > { %v1225_v42 = vmul.f32 1.442695, %v1216_v41 }
 0x29b   : > { %2490 = vpow2.f32 %v1225_v42 }
 0x29d   : > { %v2489_v43 = vpop.eup %2488 }
 0x29e   : > { %v1199_v44 = vpop.xlane.xlu1 %1198  ;;  %v1205_v45 = vpop.xlane.xlu0 %1204  ;;  %v1239_v46 = vsel %vm1190_vm4, %v2489_v43, 0.0 }
 0x29f   : > { %v1217_v47 = vsub.f32 %v806_v60, %v1199_v44  ;;  %v1219_v48 = vsub.f32 %v958_v61, %v1205_v45  ;;  %1240 = vadd.xlane.f32.xlu0 %v1239_v46 }
 0x2a1   : > { %v1227_v49 = vmul.f32 1.442695, %v1217_v47  ;;  %v1231_v50 = vmul.f32 1.442695, %v1219_v48 }
 0x2a3   : > { %2492 = vpow2.f32 %v1227_v49 }
 0x2a4   : > { %2494 = vpow2.f32 %v1231_v50 }
 0x2a5   : > { %v3010_v51 = vpop.eup %2490 }
 0x2a6   : > { %v1202_v53 = vpop.xlane.xlu1 %1201  ;;  %v1211_v54 = vpop.xlane.xlu0 %1210  ;;  %v1242_v55 = vsel %vm1190_vm4, %v3010_v51, 0.0 }
 0x2a7   : > { %v1218_v56 = vsub.f32 %v882_v63, %v1202_v53  ;;  %v1221_v57 = vsub.f32 %v1110_v0, %v1211_v54  ;;  %1243 = vadd.xlane.f32.xlu1 %v1242_v55 }
 0x2a9   : > { %v1229_v2 = vmul.f32 1.442695, %v1218_v56  ;;  %v1235_v4 = vmul.f32 1.442695, %v1221_v57 }
 0x2ab   : > { %2496 = vpow2.f32 %v1229_v2 }
 0x2ac   : > { %2498 = vpow2.f32 %v1235_v4 }
 0x2ad   : > { %v3014_v7 = vpop.eup %2492 }
 0x2ae   : > { %v1208_v52 = vpop.xlane.xlu1 %1207  ;;  %v1245_v58 = vsel %vm1190_vm4, %v3014_v7, 0.0  ;;  %v3018_v59 = vpop.eup %2494 }
 0x2af   : > { %v1220_v60 = vsub.f32 %v1034_v31, %v1208_v52  ;;  %1246 = vadd.xlane.f32.xlu0 %v1245_v58  ;;  %v1251_v9 = vsel %vm1190_vm4, %v3018_v59, 0.0 }
 0x2b1   : > { %v1233_v61 = vmul.f32 1.442695, %v1220_v60 }
 0x2b3   : > { %2500 = vpow2.f32 %v1233_v61  ;;  %1252 = vadd.xlane.f32.xlu0 %v1251_v9 }
 0x2b5   : > { %v3022_v10 = vpop.eup %2496 }
 0x2b6   : > { %v3024_v12 = vpop.eup %2498  ;;  %v1214_v62 = vpop.xlane.xlu1 %1213  ;;  %v1248_v63 = vsel %vm1190_vm4, %v3022_v10, 0.0 }
 0x2b7   : > { %v1222_v0 = vsub.f32 %v1186_v34, %v1214_v62  ;;  %v1257_v1 = vsel %vm1190_vm4, %v3024_v12, 0.0  ;;  %1249 = vadd.xlane.f32.xlu1 %v1248_v63 }
 0x2b8   : > { %1258 = vadd.xlane.f32.xlu0 %v1257_v1 }
 0x2b9   : > { %v1237_v3 = vmul.f32 1.442695, %v1222_v0 }
 0x2bb   : > { %2502 = vpow2.f32 %v1237_v3 }
 0x2bd   : > { %v3030_v29 = vpop.eup %2500 }
 0x2be   : > { %v1254_v30 = vsel %vm1190_vm4, %v3030_v29, 0.0 }
 0x2bf   : > { %1255 = vadd.xlane.f32.xlu1 %v1254_v30 }
 0x2c5   : > { %v3034_v31 = vpop.eup %2502 }
 0x2c6   : > { %v1260_v32 = vsel %vm1190_vm4, %v3034_v31, 0.0 }
 0x2c7   : > { %1261 = vadd.xlane.f32.xlu1 %v1260_v32 }
 0x32c   : > { %v1241_v33 = vpop.xlane.xlu0 %1240 }
 0x32d   : > { %2504 = vrcp.f32 %v1241_v33 }
 0x334   : > { %v1244_v34 = vpop.xlane.xlu1 %1243 }
 0x335   : > { %2506 = vrcp.f32 %v1244_v34 }
 0x337   : > { %v2505_v35 = vpop.eup %2504 }
 0x338   : > { %v1271_v36 = vmul.f32 %v2505_v35, %v1241_v33 }
 0x33a   : > { %v1279_v37 = vsub.f32 2.0, %v1271_v36 }
 0x33c   : > { %v1287_v38 = vmul.f32 %v2505_v35, %v1279_v37  ;;  %v1247_v39 = vpop.xlane.xlu0 %1246 }
 0x33d   : > { %2508 = vrcp.f32 %v1247_v39 }
 0x33e   : > { %v1295_v40 = vmul.f32 %v2489_v43, %v1287_v38 }
 0x33f   : > { %v2507_v41 = vpop.eup %2506 }
 0x340   : > { %1303 = vst.msk [vmem:[%s3041_s17] sm:$0x1] %vm1190_vm4, %v1295_v40  ;;  %v1272_v42 = vmul.f32 %v2507_v41, %v1244_v34  ;;  %2287 = vmatmul.mubr.msk.f32.vlgmr.msra.gmra.mrb[20].mxu0 %vm295_vm0, %v1295_v40  ;;  %v1253_v44 = vpop.xlane.xlu0 %1252 }
 0x341   : > { %2510 = vrcp.f32 %v1253_v44  ;;  %2379 = vmatpush3.bf16.msra.mxu0 %v2378_v8  ;;  %2293 = vmatprep.mubr.msk.f32.mxu0 %vm2654_vm1, %v2655_v28 }
 0x342   : > { %v1280_v43 = vsub.f32 2.0, %v1272_v42  ;;  %2383 = vmatprep.subr.bf16.mxu0 %v2653_v27 }
 0x344   : > { %v1288_v45 = vmul.f32 %v2507_v41, %v1280_v43  ;;  %v1250_v46 = vpop.xlane.xlu1 %1249 }
 0x345   : > { %v1259_v47 = vpop.xlane.xlu0 %1258  ;;  %2512 = vrcp.f32 %v1250_v46 }
 0x346   : > { %v1296_v48 = vmul.f32 %v3010_v51, %v1288_v45  ;;  %2514 = vrcp.f32 %v1259_v47 }
 0x347   : > { %v2509_v49 = vpop.eup %2508 }
 0x348   : > { %1304 = vst.msk [vmem:[%s3041_s17 + $0x1] sm:$0x1] %vm1190_vm4, %v1296_v48  ;;  %v1273_v50 = vmul.f32 %v2509_v49, %v1247_v39  ;;  %2294 = vmatmul.mubr.msk.f32.vlgmr.msra.gmra.mrb[22].mxu0 %vm295_vm0, %v1296_v48 }
 0x349   : > { %2385 = vmatpush3.bf16.msra.mxu0 %v2384_v16  ;;  %2307 = vmatprep.mubr.msk.f32.mxu0 %vm2654_vm1, %v2655_v28 }
 0x34a   : > { %v1281_v5 = vsub.f32 2.0, %v1273_v50  ;;  %2389 = vmatprep.subr.bf16.mxu0 %v2653_v27 }
 0x34b   : > { %v2511_v6 = vpop.eup %2510 }
 0x34c   : > { %v1289_v8 = vmul.f32 %v2509_v49, %v1281_v5  ;;  %v1275_v51 = vmul.f32 %v2511_v6, %v1253_v44  ;;  %v1256_v53 = vpop.xlane.xlu1 %1255 }
 0x34d   : > { %2516 = vrcp.f32 %v1256_v53 }
 0x34e   : > { %v1297_v54 = vmul.f32 %v3014_v7, %v1289_v8  ;;  %v1283_v55 = vsub.f32 2.0, %v1275_v51 }
 0x34f   : > { %v2513_v56 = vpop.eup %2512 }
 0x350   : > { %v2515_v57 = vpop.eup %2514  ;;  %1305 = vst.msk [vmem:[%s3041_s17 + $0x2] sm:$0x1] %vm1190_vm4, %v1297_v54  ;;  %v1291_v11 = vmul.f32 %v2511_v6, %v1283_v55  ;;  %v1274_v13 = vmul.f32 %v2513_v56, %v1250_v46  ;;  %2301 = vmatmul.mubr.msk.f32.vlgmr.msra.gmra.mrb[12].mxu1 %vm295_vm0, %v1297_v54 }
 0x351   : > { %v1277_v16 = vmul.f32 %v2515_v57, %v1259_v47  ;;  %2388 = vmatpush3.bf16.msra.mxu1 %v2387_v17  ;;  %2314 = vmatprep.mubr.msk.f32.mxu1 %vm2654_vm1, %v2655_v28 }
 0x352   : > { %v1299_v2 = vmul.f32 %v3018_v59, %v1291_v11  ;;  %v1282_v4 = vsub.f32 2.0, %v1274_v13  ;;  %2392 = vmatprep.subr.bf16.mxu1 %v2653_v27 }
 0x353   : > { %v1285_v7 = vsub.f32 2.0, %v1277_v16 }
 0x354   : > { %1307 = vst.msk [vmem:[%s3041_s17 + $0x4] sm:$0x1] %vm1190_vm4, %v1299_v2  ;;  %v1290_v52 = vmul.f32 %v2513_v56, %v1282_v4  ;;  %2315 = vmatmul.mubr.msk.f32.vlgmr.msra.gmra.mrb[14].mxu1 %vm295_vm0, %v1299_v2  ;;  %v1262_v58 = vpop.xlane.xlu1 %1261 }
 0x355   : > { %v1293_v60 = vmul.f32 %v2515_v57, %v1285_v7  ;;  %2518 = vrcp.f32 %v1262_v58  ;;  %2394 = vmatpush3.bf16.msra.mxu1 %v2393_v25  ;;  %2328 = vmatprep.mubr.msk.f32.mxu1 %vm2654_vm1, %v2655_v28 }
 0x356   : > { %v1298_v14 = vmul.f32 %v3022_v10, %v1290_v52 }
 0x357   : > { %v2517_v15 = vpop.eup %2516  ;;  %v1301_v17 = vmul.f32 %v3024_v12, %v1293_v60 }
 0x358   : > { %1306 = vst.msk [vmem:[%s3041_s17 + $0x3] sm:$0x1] %vm1190_vm4, %v1298_v14  ;;  %v1276_v59 = vmul.f32 %v2517_v15, %v1256_v53  ;;  %2308 = vmatmul.mubr.msk.f32.vlgmr.msra.gmra.mrb[24].mxu0 %vm295_vm0, %v1298_v14 }
 0x359   : > { %1309 = vst.msk [vmem:[%s3041_s17 + $0x6] sm:$0x1] %vm1190_vm4, %v1301_v17  ;;  %2329 = vmatmul.mubr.msk.f32.vlgmr.msra.gmra.mrb[16].mxu1 %vm295_vm0, %v1301_v17  ;;  %2391 = vmatpush3.bf16.msra.mxu0 %v2390_v21 }
 0x35a   : > { %v1284_v20 = vsub.f32 2.0, %v1276_v59  ;;  %2321 = vmatprep.mubr.msk.f32.mxu0 %vm2654_vm1, %v2655_v28  ;;  %2395 = vmatprep.subr.bf16.mxu0 %v2653_v27 }
 0x35c   : > { %v1292_v22 = vmul.f32 %v2517_v15, %v1284_v20 }
 0x35e   : > { %v1300_v25 = vmul.f32 %v3030_v29, %v1292_v22 }
 0x35f   : > { %v2519_v61 = vpop.eup %2518 }
 0x360   : > { %1308 = vst.msk [vmem:[%s3041_s17 + $0x5] sm:$0x1] %vm1190_vm4, %v1300_v25  ;;  %v1278_v9 = vmul.f32 %v2519_v61, %v1262_v58  ;;  %2322 = vmatmul.mubr.msk.f32.vlgmr.msra.gmra.mrb[26].mxu0 %vm295_vm0, %v1300_v25 }
 0x361   : > { %2397 = vmatpush3.bf16.msra.mxu0 %v2396_v26  ;;  %2335 = vmatprep.mubr.msk.f32.mxu0 %vm2654_vm1, %v2655_v28 }
 0x362   : > { %v1286_v18 = vsub.f32 2.0, %v1278_v9 }
 0x364   : > { %v1294_v19 = vmul.f32 %v2519_v61, %v1286_v18 }
 0x366   : > { %v1302_v21 = vmul.f32 %v3034_v31, %v1294_v19 }
 0x368   : > { %1310 = vst.msk [vmem:[%s3041_s17 + $0x7] sm:$0x1] %vm1190_vm4, %v1302_v21  ;;  %2336 = vmatmul.mubr.msk.f32.vlgmr.msra.gmra.mrb[28].mxu0 %vm295_vm0, %v1302_v21 }
 0x369   : > { %2563 = shalt.err (!%p2560_p4)
}
 0x36a   : > { %s2564_s9 = scalar_lea.hbm %s3114_s12, 128  ;;  %s2568_s17 = scalar_lea.hbm %s3215_s5, 256 }
 0x36b   : > { %p2565_p5 = scmp.ne.s32.totalorder %s3114_s12, %s2564_s9  ;;  %p2569_p1 = scmp.lt.u32.totalorder %s3114_s12, %s3215_s5 }
 0x36c   : > { %p2570_p3 = scmp.lt.u32.totalorder %s2568_s17, %s2564_s9  ;;  %p2572_p11 = scmp.lt.u32.totalorder %s2564_s9, %s3114_s12 }
 0x36d   : > { %p2566_p7 = pnand %p2565_p5, %p3224_p12 }
 0x36e   : > { %p2571_p6 = por %p2570_p3, %p2569_p1 }
 0x36f   : > { %p2567_p9 = pneg %p2566_p7 }
 0x370   : > { %p2573_p13 = por %p2572_p11, %p2571_p6 }
 0x372   : > { %p2574_p8 = pnand %p2573_p13, %p2567_p9 }
 0x374   : > { %2577 = shalt.err (!%p2574_p8)
}
 0x375   : > { %s2657_s16 = smov 16   ;;  %s2658_s29 = smov 1  }
 0x376   : > { %2401 = dma.vmem_to_hbm [thread:$0]  (%p3224_p12), %s3117_s14, 128, %s3114_s12, %s1909_s15, %s2657_s16, %s2657_s16, %s2658_s29  }
 0x377   : > { %s261_s8 = scalar_lea.vmem [#allocation5], %s2061_s13  ;;  %s3162_s15 = scalar_lea.hbm %s3214_s4, %s2130_s25 }
 0x378   : > { %s1922_s13 = sshll.u32 %s261_s8, 4  ;;  %s1904_s7 = scalar_lea.sflag [#allocation4], %s2794_s23  ;;  %s3155_s13 = int_to_ptr.vmem [resolvable:$true] %s1922_s13 }
 0x379   : > { %s2578_s9 = scalar_lea.vmem %s3155_s13, 128  ;;  %s2659_s10 = smov [#allocation5]  }
 0x37a   : > { %p2579_p10 = scmp.ne.s32.totalorder %s3155_s13, %s2578_s9  ;;  %s2582_s22 = sshll.u32 %s2659_s10, 4  ;;  %s2583_s22 = int_to_ptr.vmem [resolvable:$false] %s2582_s22 }
 0x37b   : > { %s2584_s11 = scalar_lea.vmem %s2583_s22, 256  ;;  %p2585_p4 = scmp.lt.s32.totalorder %s3155_s13, %s2583_s22 }
 0x37c   : > { %p2580_p0 = pnand %p2579_p10, %p3224_p12  ;;  %p2586_p5 = scmp.lt.s32.totalorder %s2584_s11, %s2578_s9 }
 0x37e   : > { %p2581_p2 = pneg %p2580_p0  ;;  %p2587_p7 = por %p2586_p5, %p2585_p4 }
 0x380   : > { %p2588_p9 = pnand %p2587_p7, %p2581_p2 }
 0x413   : > { %v1380_v23 = vpop.f32.mrb[20].mxu0 }
 0x414   : > { %1895 = vst.msk [vmem:[%s261_s8] sm:$0x1] %vm1190_vm4, %v1380_v23  ;;  %v2288_v24 = vpop.f32.mrb[21].mxu0 }
 0x41b   : > { %v1453_v26 = vpop.f32.mrb[22].mxu0 }
 0x41c   : > { %1896 = vst.msk [vmem:[%s261_s8 + $0x1] sm:$0x1] %vm1190_vm4, %v1453_v26  ;;  %v2295_v27 = vpop.f32.mrb[23].mxu0 }
 0x423   : > { %v1526_v28 = vpop.f32.mrb[12].mxu1 }
 0x424   : > { %1897 = vst.msk [vmem:[%s261_s8 + $0x2] sm:$0x1] %vm1190_vm4, %v1526_v28  ;;  %v2302_v10 = vpop.f32.mrb[13].mxu1 }
 0x427   : > { %v1672_v12 = vpop.f32.mrb[14].mxu1 }
 0x428   : > { %1899 = vst.msk [vmem:[%s261_s8 + $0x4] sm:$0x1] %vm1190_vm4, %v1672_v12  ;;  %v2316_v62 = vpop.f32.mrb[15].mxu1 }
 0x42b   : > { %v1599_v63 = vpop.f32.mrb[24].mxu0 }
 0x42c   : > { %1898 = vst.msk [vmem:[%s261_s8 + $0x3] sm:$0x1] %vm1190_vm4, %v1599_v63  ;;  %v1818_v0 = vpop.f32.mrb[16].mxu1  ;;  %v2309_v1 = vpop.f32.mrb[25].mxu0 }
 0x42d   : > { %1901 = vst.msk [vmem:[%s261_s8 + $0x6] sm:$0x1] %vm1190_vm4, %v1818_v0  ;;  %v2330_v3 = vpop.f32.mrb[17].mxu1 }
 0x433   : > { %v1745_v29 = vpop.f32.mrb[26].mxu0 }
 0x434   : > { %1900 = vst.msk [vmem:[%s261_s8 + $0x5] sm:$0x1] %vm1190_vm4, %v1745_v29  ;;  %v2323_v30 = vpop.f32.mrb[27].mxu0 }
 0x43b   : > { %v1891_v31 = vpop.f32.mrb[28].mxu0 }
 0x43c   : > { %1902 = vst.msk [vmem:[%s261_s8 + $0x7] sm:$0x1] %vm1190_vm4, %v1891_v31  ;;  %v2337_v32 = vpop.f32.mrb[29].mxu0 }
 0x43d   : > { %2591 = shalt.err (!%p2588_p9)
}
 0x43e   : > { %s2592_s25 = scalar_lea.hbm %s3162_s15, 128  ;;  %s2596_s28 = scalar_lea.hbm %s3214_s4, 256 }
 0x43f   : > { %p2593_p1 = scmp.ne.s32.totalorder %s3162_s15, %s2592_s25  ;;  %p2597_p11 = scmp.lt.u32.totalorder %s3162_s15, %s3214_s4 }
 0x440   : > { %p2598_p13 = scmp.lt.u32.totalorder %s2596_s28, %s2592_s25  ;;  %p2600_p10 = scmp.lt.u32.totalorder %s2592_s25, %s3162_s15 }
 0x441   : > { %p2594_p3 = pnand %p2593_p1, %p3224_p12 }
 0x442   : > { %p2599_p8 = por %p2598_p13, %p2597_p11 }
 0x443   : > { %p2595_p6 = pneg %p2594_p3 }
 0x444   : > { %p2601_p0 = por %p2600_p10, %p2599_p8 }
 0x446   : > { %p2602_p2 = pnand %p2601_p0, %p2595_p6 }
 0x448   : > { %2605 = shalt.err (!%p2602_p2)
}
 0x449   : > { %2400 = dma.vmem_to_hbm [thread:$0]  (%p3224_p12), %s3155_s13, 128, %s3162_s15, %s1904_s7, %s2657_s16, %s2657_s16, %s2658_s29  }
 0x44a PF: > { %s1953_s14 = sand.u32 1, %s2636_s18   ;;  %p3225_p4 = scmp.ne.s32.totalorder %s3220_s6, 0 }
 0x44b   : > { %p3226_p5 = scmp.ge.s32.totalorder %s2648_s21, 2  ;;  %s1954_s9 = scalar_lea.sflag [#allocation4], %s1953_s14 }
 0x44d   : > { %p2409_p7 = pnand %p3226_p5, %p3225_p4 }
 0x44f   : > { %2627 = dma.done.wait (!%p2409_p7), %s1954_s9, 128  }
 0x450   : > { %2629 = vsyncadd (!%p2409_p7), %s1954_s9, 4294967168  ;;  %s1963_s30 = scalar_lea.sflag [#allocation7], %s1953_s14 }
 0x451   : > { %2631 = dma.done.wait (!%p2409_p7), %s1963_s30, 128  }
 0x452   : > { %2633 = vsyncadd (!%p2409_p7), %s1963_s30, 4294967168  ;;  %p22_p12 = scmp.ge.s32.totalorder %s2715_s24, 4   ;;  %s3227_s18 = smov %s2640_s19 }
 0x453   : > { %s3228_s19 = smov %s2644_s20  ;;  %s3229_s20 = smov %s2727_s27 }
 0x454   : > { %s3230_s21 = smov %s2715_s24  ;;  %24 = sbr.rel (!%p22_p12) target bundleno = 7 (0x7), region = 101 }
 0x45b   :  { %1968 = vsyncpa [#allocation3], 1 }
 0x45c   :  { %1970 = vsyncpa [#allocation3 + $0x1], 1 }
 0x45d   :  { %1971 = vsyncpa [#allocation4], 1 }
 0x45e   :  { %1973 = vsyncpa [#allocation4 + $0x1], 1 }
 0x45f   :  { %1974 = vsyncpa [#allocation7], 1 }
 0x460   :  { %1976 = vsyncpa [#allocation7 + $0x1], 1 }

</bundles_post_ra>
